<compile_context>
chip_gen: v7x
topology: tpu7x:2x2x1
jax: 0.10.0
libtpu: 0.0.40
codegen_flags: <defaults>
</compile_context>

<pallas_src>
import math

import jax
import jax.numpy as jnp
from jax.experimental import pallas as pl
from jax.experimental.pallas import tpu as pltpu

_MIB = 1024 * 1024
_INV_SQRT2 = 1.0 / math.sqrt(2.0)


def _round_up(x, m):
    return ((x + m - 1) // m) * m


def _mlp_kernel(x_ref, w1_ref, b1_ref, w2_ref, b2_ref, o_ref, acc_ref):
    # x_ref : (tm, D)          activation row tile (compute dtype)
    # w1_ref: (D, th)          c_fc weight slice
    # b1_ref: (1, th)   f32    c_fc bias slice
    # w2_ref: (th, D)          c_proj weight slice
    # b2_ref: (1, D)    f32    c_proj bias
    # o_ref : (tm, D)          output tile (resident across the hk axis)
    # acc_ref: (tm, D)  f32    accumulator scratch
    hk = pl.program_id(1)

    @pl.when(hk == 0)
    def _():
        acc_ref[...] = jnp.zeros_like(acc_ref)

    # c_fc partial: x @ W1[:, hk-slice] + b1[hk-slice]   (f32 accumulate on MXU)
    h = jnp.dot(x_ref[...], w1_ref[...], preferred_element_type=jnp.float32)
    h = h + b1_ref[...]

    # exact GELU (torch.nn.GELU default, erf form) — erf maps to the EUP slot
    h = 0.5 * h * (1.0 + jax.lax.erf(h * _INV_SQRT2))

    # c_proj partial: accumulate h_tile @ W2[hk-slice, :] into the f32 scratch
    acc_ref[...] += jnp.dot(h.astype(w2_ref.dtype), w2_ref[...],
                            preferred_element_type=jnp.float32)

    # epilogue: add b2 once, write the output tile (dropout = identity)
    @pl.when(hk == pl.num_programs(1) - 1)
    def _():
        o_ref[...] = (acc_ref[...] + b2_ref[...]).astype(o_ref.dtype)


def _vmem_budget_bytes():
    """(usable budget, physical capacity) of per-core VMEM, generation-aware."""
    cap = 64 * _MIB  # conservative fallback = v7x per-TensorCore VMEM
    try:
        info = pltpu.get_tpu_info()
        cap_attr = getattr(info, "vmem_capacity_bytes", None)
        if cap_attr:
            cap = int(cap_attr)
    except Exception:
        pass
    # Leave headroom for semaphores / compiler-internal scratch:
    #   128 MiB parts -> ~105 MiB, 64 MiB parts -> ~52 MiB.
    budget = max(16 * _MIB, min(cap - 12 * _MIB, int(cap * 0.82)))
    return budget, cap


def _vmem_estimate(tm, th, D, H, in_sz, out_sz):
    """Heuristic VMEM usage for one tiling (double-buffered tiles + scratch)."""
    return (2 * tm * D * in_sz          # x tiles
            + 2 * tm * D * out_sz       # out tiles
            + tm * D * 4                # f32 accumulator scratch
            + tm * th * (4 + in_sz)     # (tm, th) GELU intermediate + cast copy
            + 2 * D * th * in_sz        # W1 slices
            + 2 * th * D * in_sz        # W2 slices
            + 2 * 8 * th * 4            # b1 slices (sublane-padded)
            + 2 * 8 * D * 4)            # b2


def _tm_candidates(M, row_align, tm_req):
    if tm_req is not None:
        tm = min(int(tm_req), M)
        if tm < M:
            tm = max(row_align, (tm // row_align) * row_align)
            tm = min(tm, M)
        return [tm]
    cands = []
    if M <= 1024 and M % row_align == 0:
        cands.append(M)                               # single full-row tile
    cands += [c for c in (1024, 512, 256, 128) if c < M]
    if not cands:
        cands = [M]                                   # tiny M: block == full dim
    return cands


def _th_candidates(H, th_req):
    if th_req is not None and H % int(th_req) == 0:
        return [int(th_req)]
    cands = [H]                                       # fully-resident weights first
    cands += [c for c in (2048, 1024, 512, 256, 128) if c < H and H % c == 0]
    return cands


def _pick_tiles(M, D, H, in_sz, out_sz, budget, row_align, tm_req, th_req):
    tm_cands = _tm_candidates(M, row_align, tm_req)
    th_cands = _th_candidates(H, th_req)
    for tm in tm_cands:                               # tm is the dominant lever
        for th in th_cands:
            if _vmem_estimate(tm, th, D, H, in_sz, out_sz) <= budget:
                return tm, th
    return tm_cands[-1], th_cands[-1]


def mlp_forward(x, w1, b1, w2, b2, *, tm=None, th=None, compute_dtype=None):
    """Fused MLP forward: Dropout(c_proj(GELU(c_fc(x)))) with dropout=identity.

    x: [..., D]; w1: [D, 4D]; b1: [4D]; w2: [4D, D]; b2: [D].
    compute_dtype: matmul-input dtype (pass jnp.bfloat16 on v6e/v7x for MXU
    throughput); accumulation, biases and GELU stay float32.  For best
    performance, pass w1/w2 already stored in compute_dtype so no per-call
    weight cast is emitted.
    """
    orig_shape = x.shape
    D = x.shape[-1]
    H = w1.shape[-1]
    M = 1
    for s in x.shape[:-1]:
        M *= int(s)

    out_dtype = x.dtype
    cd = jnp.dtype(compute_dtype) if compute_dtype is not None else jnp.dtype(x.dtype)
    in_sz = cd.itemsize
    out_sz = jnp.dtype(out_dtype).itemsize

    budget, vmem_cap = _vmem_budget_bytes()
    row_align = 16 if in_sz < 4 else 8    # sub-32-bit dtypes pack 2 rows/sublane
    tm, th = _pick_tiles(M, D, H, in_sz, out_sz, budget, row_align, tm, th)

    x2d = x.reshape(M, D)
    if x2d.dtype != cd:
        x2d = x2d.astype(cd)
    # Avoid a per-call weight-sized HBM round trip when weights are pre-cast.
    w1c = w1 if w1.dtype == cd else w1.astype(cd)
    w2c = w2 if w2.dtype == cd else w2.astype(cd)
    b1r = b1.reshape(1, H).astype(jnp.float32)
    b2r = b2.reshape(1, D).astype(jnp.float32)

    n_row_tiles = pl.cdiv(M, tm)
    grid = (n_row_tiles, H // th)

    # Weights are re-streamed once per row tile only if both grid axes have
    # extent > 1 (with th == H their block index is constant -> single DMA).
    weight_passes = 1 if (th == H or n_row_tiles == 1) else n_row_tiles
    cost = pl.CostEstimate(
        flops=4 * M * D * H,                          # two matmuls
        transcendentals=M * H,                        # erf
        bytes_accessed=int(M * D * in_sz              # x
                           + weight_passes * 2 * D * H * in_sz   # streamed W1+W2
                           + (H + D) * 4              # biases
                           + M * D * out_sz),         # output
    )

    est = _vmem_estimate(tm, th, D, H, in_sz, out_sz)
    vmem_limit = int(min(max(budget, 2 * est), vmem_cap - 8 * _MIB))
    vmem_limit = max(vmem_limit, 16 * _MIB)

    out2d = pl.pallas_call(
        _mlp_kernel,
        out_shape=jax.ShapeDtypeStruct((M, D), out_dtype),
        grid_spec=pltpu.PrefetchScalarGridSpec(
            num_scalar_prefetch=0,
            grid=grid,
            in_specs=[
                pl.BlockSpec((tm, D), lambda i, hk: (i, 0)),    # x row tile
                pl.BlockSpec((D, th), lambda i, hk: (0, hk)),   # W1 hk-slice
                pl.BlockSpec((1, th), lambda i, hk: (0, hk)),   # b1 hk-slice
                pl.BlockSpec((th, D), lambda i, hk: (hk, 0)),   # W2 hk-slice
                pl.BlockSpec((1, D),  lambda i, hk: (0, 0)),    # b2
            ],
            out_specs=pl.BlockSpec((tm, D), lambda i, hk: (i, 0)),
            scratch_shapes=[pltpu.VMEM((tm, D), jnp.float32)],
        ),
        compiler_params=pltpu.CompilerParams(
            dimension_semantics=("parallel", "arbitrary"),
            vmem_limit_bytes=vmem_limit,
        ),
        cost_estimate=cost,
    )(x2d, w1c, b1r, w2c, b2r)

    return out2d.reshape(orig_shape)


def _reference(x, w1, b1, w2, b2):
    h = x @ w1 + b1
    h = 0.5 * h * (1.0 + jax.lax.erf(h / jnp.sqrt(2.0)))
    return h @ w2 + b2


if __name__ == "__main__":
    # small config: batch=2, seq=8, n_embd=32 -> hidden = 4*32 = 128
    B, S, D = 2, 8, 32
    H = 4 * D

    key = jax.random.PRNGKey(0)
    kx, k1, kb1, k2, kb2, kx2 = jax.random.split(key, 6)

    x = jax.random.normal(kx, (B, S, D), dtype=jnp.float32)

    # deterministic parameter init (shapes per nn.Linear; stored as [in, out])
    bound1 = 1.0 / math.sqrt(D)
    w1 = jax.random.uniform(k1, (D, H), minval=-bound1, maxval=bound1,
                            dtype=jnp.float32)
    b1 = jax.random.uniform(kb1, (H,), minval=-bound1, maxval=bound1,
                            dtype=jnp.float32)
    bound2 = 1.0 / math.sqrt(H)
    w2 = jax.random.uniform(k2, (H, D), minval=-bound2, maxval=bound2,
                            dtype=jnp.float32)
    b2 = jax.random.uniform(kb2, (D,), minval=-bound2, maxval=bound2,
                            dtype=jnp.float32)

    ref = _reference(x, w1, b1, w2, b2)

    # f32 path (tight check)
    out = mlp_forward(x, w1, b1, w2, b2)
    jax.block_until_ready(out)
    assert out.shape == (B, S, D)
    assert jnp.allclose(out, ref, atol=1e-5, rtol=1e-5), "f32 mismatch vs reference"

    # bf16 compute path with pre-cast weights (no per-call weight cast), f32 acc
    w1_bf, w2_bf = w1.astype(jnp.bfloat16), w2.astype(jnp.bfloat16)
    out_bf = mlp_forward(x, w1_bf, b1, w2_bf, b2, compute_dtype=jnp.bfloat16)
    jax.block_until_ready(out_bf)
    assert out_bf.shape == (B, S, D)
    assert jnp.allclose(out_bf.astype(jnp.float32), ref, atol=5e-2, rtol=5e-2), \
        "bf16 mismatch vs reference"

    # ragged row count: exercises the cdiv boundary block (no host-side padding)
    B2, S2 = 2, 520   # M = 1040 -> tm = 1024 + partial 16-row boundary block
    x2 = jax.random.normal(kx2, (B2, S2, D), dtype=jnp.float32)
    ref2 = _reference(x2, w1, b1, w2, b2)
    out2 = mlp_forward(x2, w1, b1, w2, b2)
    jax.block_until_ready(out2)
    assert out2.shape == (B2, S2, D)
    assert jnp.allclose(out2, ref2, atol=1e-5, rtol=1e-5), "ragged mismatch vs reference"

    print("KERNEL_OK")
</pallas_src>

<mosaic_0001>
module attributes {stable_mosaic.version = 11 : i64} {
  func.func @_mlp_kernel(%arg0: i32, %arg1: i32, %arg2: memref<16x32xf32, #tpu.memory_space<vmem>>, %arg3: memref<32x128xf32, #tpu.memory_space<vmem>>, %arg4: memref<1x128xf32, #tpu.memory_space<vmem>>, %arg5: memref<128x32xf32, #tpu.memory_space<vmem>>, %arg6: memref<1x32xf32, #tpu.memory_space<vmem>>, %arg7: memref<16x32xf32, #tpu.memory_space<vmem>>, %arg8: memref<16x32xf32, #tpu.memory_space<vmem>>) attributes {dimension_semantics = [#tpu.dimension_semantics<parallel>, #tpu.dimension_semantics<arbitrary>], iteration_bounds = array<i64: 1, 1>, scalar_prefetch = 0 : i64, scratch_operands = 1 : i64, tpu.core_type = #tpu.core_type<tc>, window_params = [{transform_indices = @transform_0, window_bounds = array<i64: 16, 32>}, {transform_indices = @transform_1, window_bounds = array<i64: 32, 128>}, {transform_indices = @transform_2, window_bounds = array<i64: 1, 128>}, {transform_indices = @transform_3, window_bounds = array<i64: 128, 32>}, {pipeline_mode = #tpu.pipeline_mode<synchronous>, transform_indices = @transform_4, window_bounds = array<i64: 1, 32>}, {transform_indices = @transform_5, window_bounds = array<i64: 16, 32>}]} {
    %c0_i32 = arith.constant 0 : i32
    %0 = arith.cmpi eq, %arg1, %c0_i32 : i32
    %1 = arith.extui %0 : i1 to i32
    %c0_i32_0 = arith.constant 0 : i32
    %2 = arith.cmpi ne, %1, %c0_i32_0 : i32
    scf.if %2 {
      %cst_18 = arith.constant 0.000000e+00 : f32
      %25 = vector.broadcast %cst_18 : f32 to vector<16x32xf32>
      %c0_19 = arith.constant 0 : index
      %c0_20 = arith.constant 0 : index
      %26 = vector.load %arg8[%c0_19, %c0_20] : memref<16x32xf32, #tpu.memory_space<vmem>>, vector<16x32xf32>
      tpu.vector_store %arg8[%c0_19, %c0_20], %25 {strides = array<i32>} : memref<16x32xf32, #tpu.memory_space<vmem>>, vector<16x32xf32>,
    } else {
    }
    %c0 = arith.constant 0 : index
    %c0_1 = arith.constant 0 : index
    %3 = vector.load %arg2[%c0, %c0_1] : memref<16x32xf32, #tpu.memory_space<vmem>>, vector<16x32xf32>
    %c0_2 = arith.constant 0 : index
    %c0_3 = arith.constant 0 : index
    %4 = vector.load %arg3[%c0_2, %c0_3] : memref<32x128xf32, #tpu.memory_space<vmem>>, vector<32x128xf32>
    %cst = arith.constant dense<0.000000e+00> : vector<16x128xf32>
    %5 = tpu.matmul %3, %4, %cst {dimension_numbers = #tpu.dot_dimension_numbers<[1], [0], [0], [1], [0, 0, 1, 1], [], []>} : vector<16x32xf32>, vector<32x128xf32>, vector<16x128xf32> -> vector<16x128xf32>
    %c0_4 = arith.constant 0 : index
    %c0_5 = arith.constant 0 : index
    %6 = vector.load %arg4[%c0_4, %c0_5] : memref<1x128xf32, #tpu.memory_space<vmem>>, vector<1x128xf32>
    %7 = vector.broadcast %6 : vector<1x128xf32> to vector<16x128xf32>
    %8 = arith.addf %5, %7 : vector<16x128xf32>
    %cst_6 = arith.constant 5.000000e-01 : f32
    %9 = vector.broadcast %cst_6 : f32 to vector<16x128xf32>
    %10 = arith.mulf %9, %8 : vector<16x128xf32>
    %cst_7 = arith.constant 0.707106769 : f32
    %11 = vector.broadcast %cst_7 : f32 to vector<16x128xf32>
    %12 = arith.mulf %8, %11 : vector<16x128xf32>
    %13 = math.erf %12 : vector<16x128xf32>
    %cst_8 = arith.constant 1.000000e+00 : f32
    %14 = vector.broadcast %cst_8 : f32 to vector<16x128xf32>
    %15 = arith.addf %14, %13 : vector<16x128xf32>
    %16 = arith.mulf %10, %15 : vector<16x128xf32>
    %c0_9 = arith.constant 0 : index
    %c0_10 = arith.constant 0 : index
    %17 = vector.load %arg8[%c0_9, %c0_10] : memref<16x32xf32, #tpu.memory_space<vmem>>, vector<16x32xf32>
    %c0_11 = arith.constant 0 : index
    %c0_12 = arith.constant 0 : index
    %18 = vector.load %arg5[%c0_11, %c0_12] : memref<128x32xf32, #tpu.memory_space<vmem>>, vector<128x32xf32>
    %cst_13 = arith.constant dense<0.000000e+00> : vector<16x32xf32>
    %19 = tpu.matmul %16, %18, %cst_13 {dimension_numbers = #tpu.dot_dimension_numbers<[1], [0], [0], [1], [0, 0, 1, 1], [], []>} : vector<16x128xf32>, vector<128x32xf32>, vector<16x32xf32> -> vector<16x32xf32>
    %20 = arith.addf %17, %19 : vector<16x32xf32>
    %c0_14 = arith.constant 0 : index
    %c0_15 = arith.constant 0 : index
    %21 = vector.load %arg8[%c0_14, %c0_15] : memref<16x32xf32, #tpu.memory_space<vmem>>, vector<16x32xf32>
    tpu.vector_store %arg8[%c0_14, %c0_15], %20 {strides = array<i32>} : memref<16x32xf32, #tpu.memory_space<vmem>>, vector<16x32xf32>,
    %c0_i32_16 = arith.constant 0 : i32
    %22 = arith.cmpi eq, %arg1, %c0_i32_16 : i32
    %23 = arith.extui %22 : i1 to i32
    %c0_i32_17 = arith.constant 0 : i32
    %24 = arith.cmpi ne, %23, %c0_i32_17 : i32
    scf.if %24 {
      %c0_18 = arith.constant 0 : index
      %c0_19 = arith.constant 0 : index
      %25 = vector.load %arg8[%c0_18, %c0_19] : memref<16x32xf32, #tpu.memory_space<vmem>>, vector<16x32xf32>
      %c0_20 = arith.constant 0 : index
      %c0_21 = arith.constant 0 : index
      %26 = vector.load %arg6[%c0_20, %c0_21] : memref<1x32xf32, #tpu.memory_space<vmem>>, vector<1x32xf32>
      %27 = vector.broadcast %26 : vector<1x32xf32> to vector<16x32xf32>
      %28 = arith.addf %25, %27 : vector<16x32xf32>
      %c0_22 = arith.constant 0 : index
      %c0_23 = arith.constant 0 : index
      %29 = vector.load %arg7[%c0_22, %c0_23] : memref<16x32xf32, #tpu.memory_space<vmem>>, vector<16x32xf32>
      tpu.vector_store %arg7[%c0_22, %c0_23], %28 {strides = array<i32>} : memref<16x32xf32, #tpu.memory_space<vmem>>, vector<16x32xf32>,
    } else {
    }
    return
  }
  func.func @transform_0(%arg0: i32, %arg1: i32) -> (i32, i32) {
    %c0_i32 = arith.constant 0 : i32
    %c0_i32_0 = arith.constant 0 : i32
    return %arg0, %c0_i32 : i32, i32
  }
  func.func @transform_1(%arg0: i32, %arg1: i32) -> (i32, i32) {
    %c0_i32 = arith.constant 0 : i32
    %c0_i32_0 = arith.constant 0 : i32
    return %c0_i32, %arg1 : i32, i32
  }
  func.func @transform_2(%arg0: i32, %arg1: i32) -> (i32, i32) {
    %c0_i32 = arith.constant 0 : i32
    %c0_i32_0 = arith.constant 0 : i32
    return %c0_i32, %arg1 : i32, i32
  }
  func.func @transform_3(%arg0: i32, %arg1: i32) -> (i32, i32) {
    %c0_i32 = arith.constant 0 : i32
    %c0_i32_0 = arith.constant 0 : i32
    return %arg1, %c0_i32 : i32, i32
  }
  func.func @transform_4(%arg0: i32, %arg1: i32) -> (i32, i32) {
    %c0_i32 = arith.constant 0 : i32
    %c0_i32_0 = arith.constant 0 : i32
    %c0_i32_1 = arith.constant 0 : i32
    return %c0_i32, %c0_i32_0 : i32, i32
  }
  func.func @transform_5(%arg0: i32, %arg1: i32) -> (i32, i32) {
    %c0_i32 = arith.constant 0 : i32
    %c0_i32_0 = arith.constant 0 : i32
    return %arg0, %c0_i32 : i32, i32
  }
}

</mosaic_0001>

<bundles_post_ra>
// kernel: tpu_custom_call.1
= control target key start
LH: loop header
LB: loop body
LE: loop exit
PB: predicated region body
PF: predicated region fallthrough
CT: control target
= control target key end

     0   :  { %vm25_vm0 = vcmask 261120   ;;  %s534_s0 = inlined_call_operand.vmem [shape: f32[16,32], index: 0, kind: input, shape index: {}]   ;;  %s535_s1 = inlined_call_operand.vmem [shape: f32[32,128], index: 1, kind: input, shape index: {}]   ;;  %s536_s2 = inlined_call_operand.vmem [shape: f32[1,128], index: 2, kind: input, shape index: {}]   ;;  %s537_s3 = inlined_call_operand.vmem [shape: f32[128,32], index: 3, kind: input, shape index: {}]   ;;  %s538_s4 = inlined_call_operand.vmem [shape: f32[1,32], index: 4, kind: input, shape index: {}]   ;;  %s539_s5 = inlined_call_operand.hbm [shape: f32[16,32], index: 5, kind: output, shape index: {}]  }
   0x1   :  { %v30_v0 = vld [vmem:[%s535_s1] sm:$0xff]  ;;  %v31_v1 = vld [vmem:[%s535_s1 + $0x8] sm:$0xff]  ;;  %v32_v2 = vld [vmem:[%s535_s1 + $0x10] sm:$0xff] }
   0x2   :  { %v336_v3 = vpack.c.bf16 %v31_v1, %v30_v0  ;;  %v33_v4 = vld [vmem:[%s535_s1 + $0x18] sm:$0xff]  ;;  %v28_v5 = vld [vmem:[%s534_s0] sm:$0xff]  ;;  %v136_v8 = vld [vmem:[%s537_s3 + $0x8] sm:$0xff] }
   0x3   :  { %v340_v6 = vpack.c.bf16 %v33_v4, %v32_v2  ;;  %298 = vmatprep.mubr.msk.f32.mxu0 %vm25_vm0, %v28_v5  ;;  %v135_v7 = vld [vmem:[%s537_s3] sm:$0xff]  ;;  %v137_v9 = vld [vmem:[%s537_s3 + $0x10] sm:$0xff]  ;;  %v138_v11 = vld [vmem:[%s537_s3 + $0x18] sm:$0xff] }
   0x4   :  { %337 = vmatprep.subr.bf16.mxu0 %v336_v3  ;;  %v344_v10 = vpack.c.bf16 %v136_v8, %v135_v7  ;;  %v348_v12 = vpack.c.bf16 %v138_v11, %v137_v9  ;;  %v139_v13 = vld [vmem:[%s537_s3 + $0x20] sm:$0xff]  ;;  %v140_v14 = vld [vmem:[%s537_s3 + $0x28] sm:$0xff] }
   0x5   :  { %339 = vmatpush3.bf16.msra.mxu0 %v336_v3 }
   0x6   :  { %10 = vsyncpa [#allocation4], 0  ;;  %341 = vmatprep.subr.bf16.mxu0 %v340_v6  ;;  %345 = vmatprep.subr.bf16.mxu1 %v344_v10  ;;  %v352_v15 = vpack.c.bf16 %v140_v14, %v139_v13  ;;  %v29_v16 = vld [vmem:[%s534_s0 + $0x8] sm:$0xff]  ;;  %v141_v17 = vld [vmem:[%s537_s3 + $0x30] sm:$0xff]  ;;  %v408_v32 = vmov 0.0   ;;  %s409_s11 = smov [#allocation3]  }
   0x7   :  { %347 = vmatpush3.bf16.msra.mxu1 %v344_v10  ;;  %v142_v18 = vld [vmem:[%s537_s3 + $0x38] sm:$0xff]  ;;  %v143_v20 = vld [vmem:[%s537_s3 + $0x40] sm:$0xff]  ;;  %v144_v21 = vld [vmem:[%s537_s3 + $0x48] sm:$0xff]  ;;  %27 = vst.msk [vmem:[#allocation2 + $0x8] sm:$0xff] %vm25_vm0, %v408_v32  ;;  %s251_s12 = sshll.u32 %s409_s11, 4  ;;  %s252_s12 = int_to_ptr.vmem [resolvable:$true] %s251_s12 }
   0x8   :  { %349 = vmatprep.subr.bf16.mxu1 %v348_v12  ;;  %v356_v19 = vpack.c.bf16 %v142_v18, %v141_v17  ;;  %v360_v22 = vpack.c.bf16 %v144_v21, %v143_v20  ;;  %v145_v23 = vld [vmem:[%s537_s3 + $0x50] sm:$0xff]  ;;  %v146_v24 = vld [vmem:[%s537_s3 + $0x58] sm:$0xff]  ;;  %v147_v26 = vld [vmem:[%s537_s3 + $0x60] sm:$0xff]  ;;  %26 = vst.msk [vmem:[#allocation2] sm:$0xff] %vm25_vm0, %v408_v32  ;;  %s384_s13 = scalar_lea.vmem %s252_s12, 256  ;;  %p389_p1 = scmp.lt.s32.totalorder %s252_s12, %s252_s12 }
   0x9   :  { %343 = vmatpush3.bf16.msra.mxu0 %v340_v6  ;;  %v364_v25 = vpack.c.bf16 %v146_v24, %v145_v23  ;;  %v148_v27 = vld [vmem:[%s537_s3 + $0x68] sm:$0xff]  ;;  %v149_v29 = vld [vmem:[%s537_s3 + $0x70] sm:$0xff]  ;;  %v150_v30 = vld [vmem:[%s537_s3 + $0x78] sm:$0xff]  ;;  %p385_p0 = scmp.ne.s32.totalorder %s252_s12, %s384_s13  ;;  %p390_p2 = scmp.lt.s32.totalorder %s384_s13, %s384_s13 }
   0xa   :  { %v368_v28 = vpack.c.bf16 %v148_v27, %v147_v26  ;;  %v372_v31 = vpack.c.bf16 %v150_v30, %v149_v29  ;;  %v262_v33 = vld [vmem:[%s536_s2] ss:$0 sm:$0xff] }
   0xb   :  { %351 = vmatpush3.bf16.msra.mxu1 %v348_v12  ;;  %v265_v54 = vld [vmem:[%s538_s4] ss:$0 sm:$0xff]  ;;  %p391_p3 = por %p390_p2, %p389_p1 }
   0xc   :  { %299 = vmatmul.mubr.msk.f32.vlgmr.msra.gmra.mrb[0].mxu0 %vm25_vm0, %v29_v16  ;;  %353 = vmatprep.subr.bf16.mxu1 %v352_v15 }
   0xd   :  { %p392_p4 = pnand %p391_p3, %p385_p0 }
   0xe   :  { %v134_v48 = vld [vmem:[#allocation2 + $0x8] sm:$0xff] }
   0xf   :  { %355 = vmatpush3.bf16.msra.mxu1 %v352_v15  ;;  %v133_v49 = vld [vmem:[#allocation2] sm:$0xff] }
  0x10   :  { %357 = vmatprep.subr.bf16.mxu1 %v356_v19 }
  0x13   :  { %359 = vmatpush3.bf16.msra.mxu1 %v356_v19 }
  0x14   :  { %361 = vmatprep.subr.bf16.mxu1 %v360_v22 }
  0x17   :  { %363 = vmatpush3.bf16.msra.mxu1 %v360_v22 }
  0x18   :  { %365 = vmatprep.subr.bf16.mxu1 %v364_v25 }
  0x1b   :  { %367 = vmatpush3.bf16.msra.mxu1 %v364_v25 }
  0x1c   :  { %369 = vmatprep.subr.bf16.mxu1 %v368_v28 }
  0x1f   :  { %371 = vmatpush3.bf16.msra.mxu1 %v368_v28 }
  0x20   :  { %373 = vmatprep.subr.bf16.mxu1 %v372_v31 }
  0x23   :  { %375 = vmatpush3.bf16.msra.mxu1 %v372_v31 }
  0xdf   :  { %v300_v34 = vpop.f32.mrb[0].mxu0 }
  0xe0   :  { %v120_v35 = vadd.f32 %v300_v34, %v262_v33  ;;  %v114_v36 = vpop.f32.mrb[1].mxu0 }
  0xe1   :  { %v115_v37 = vadd.f32 %v262_v33, %v114_v36 }
  0xe2   :  { %v126_v38 = vmul.f32 0.70710677, %v120_v35  ;;  %v124_v45 = vmul.f32 0.5, %v120_v35 }
  0xe3   :  { %v125_v39 = vmul.f32 0.70710677, %v115_v37  ;;  %v123_v43 = vmul.f32 0.5, %v115_v37 }
  0xe4   :  { %380 = verf.f32 %v126_v38 }
  0xe5   :  { %382 = verf.f32 %v125_v39 }
  0xee   :  { %v381_v40 = vpop.eup %380 }
  0xef   :  { %v383_v41 = vpop.eup %382  ;;  %v130_v42 = vadd.f32 1.0, %v381_v40 }
  0xf0   :  { %v129_v44 = vadd.f32 1.0, %v383_v41 }
  0xf1   :  { %v132_v47 = vmul.f32 %v130_v42, %v124_v45 }
  0xf2   :  { %v131_v46 = vmul.f32 %v129_v44, %v123_v43 }
  0xf4   :  { %333 = vmatprep.mubr.f32.mxu1 %v131_v46 }
  0xf5   :  { %334 = vmatmul.mubr.f32.vlgmr.msra.gmra.mrb[0].mxu1 %v132_v47 }
 0x1c8   :  { %v335_v50 = vpop.f32.mrb[0].mxu1 }
 0x1c9   :  { %v227_v51 = vadd.f32 %v335_v50, %v134_v48  ;;  %v217_v52 = vpop.f32.mrb[1].mxu1 }
 0x1ca   :  { %v226_v53 = vadd.f32 %v217_v52, %v133_v49 }
 0x1cb   :  { %229 = vst.msk [vmem:[#allocation2 + $0x8] sm:$0xff] %vm25_vm0, %v227_v51 }
 0x1cc   :  { %228 = vst.msk [vmem:[#allocation2] sm:$0xff] %vm25_vm0, %v226_v53 }
 0x1d2   :  { %v234_v55 = vld [vmem:[#allocation2 + $0x8] sm:$0xff] }
 0x1d3   :  { %v233_v56 = vld [vmem:[#allocation2] sm:$0xff]  ;;  %v243_v57 = vadd.f32 %v265_v54, %v234_v55 }
 0x1d4   :  { %v242_v58 = vadd.f32 %v265_v54, %v233_v56 }
 0x1d5   :  { %245 = vst.msk [vmem:[#allocation3 + $0x8] sm:$0xff] %vm25_vm0, %v243_v57 }
 0x1d6   :  { %244 = vst.msk [vmem:[#allocation3] sm:$0xff] %vm25_vm0, %v242_v58 }
 0x1d7   :  { %395 = shalt.err (!%p392_p4)
}
 0x1d8   :  { %s396_s15 = scalar_lea.hbm %s539_s5, 256 }
 0x1d9   :  { %p397_p5 = scmp.ne.s32.totalorder %s539_s5, %s396_s15  ;;  %p400_p6 = scmp.lt.u32.totalorder %s396_s15, %s539_s5 }
 0x1db   :  { %p402_p7 = pnand %p400_p6, %p397_p5 }
 0x1dd   :  { %405 = shalt.err (!%p402_p7)
}
 0x1de   :  { %s410_s20 = smov 128   ;;  %s411_s21 = smov 8  }
 0x1df   :  { %257 = dma.vmem_to_hbm [thread:$0]  %s252_s12, 256, %s539_s5, [#allocation4], %s410_s20, %s410_s20, %s411_s21  }
 0x1e0   :  { %406 = dma.done.wait [#allocation4], 256  }
 0x1e1   :  { %407 = vsyncadd [#allocation4], 4294967040 }
 0x1e2   :  { %261 = vsyncpa [#allocation4], 1 }

</bundles_post_ra>
